<compile_context>
chip_gen: v6e
topology: v6e:2x2x1
jax: 0.10.0
libtpu: 0.0.40
codegen_flags: <defaults>
</compile_context>

<pallas_src>
import functools

import jax
import jax.numpy as jnp
from jax.experimental import pallas as pl
from jax.experimental.pallas import tpu as pltpu


_LANE = 128            # vreg lane width: fc2 output (logit) dim padded to this
_NEG_BIG = -1e30       # f32 bias on padded action lanes -> exp() underflows to 0
_MIN_SPLIT_ROWS = 512  # only force a >=2-step grid (v7x megacore) above this


def _round_up(n, m):
    return ((n + m - 1) // m) * m


def policy_kernel(x_ref, w1_ref, b1_ref, w2_ref, b2_ref, out_ref, *, num_actions):
    """One batch tile: out = softmax(relu(x@w1+b1)@w2+b2)[:, :num_actions]."""
    # fc1: bf16 MXU inputs, f32 accumulation; bias + relu in f32.
    h = jnp.dot(x_ref[...].astype(jnp.bfloat16), w1_ref[...],
                preferred_element_type=jnp.float32)
    h = jnp.maximum(h + b1_ref[...], 0.0)

    # fc2 into the lane-padded (multiple-of-128) logit space.
    logits = jnp.dot(h.astype(jnp.bfloat16), w2_ref[...],
                     preferred_element_type=jnp.float32)
    logits = logits + b2_ref[...]          # padded lanes carry -1e30 (kept in f32)

    # Numerically-stable softmax; padded lanes contribute exp(~ -1e30) == 0.
    m = jnp.max(logits, axis=-1, keepdims=True)
    e = jnp.exp(logits - m)
    s = jnp.sum(e, axis=-1, keepdims=True)
    probs = e / s                          # exact divide: free here (HBM-bound)

    # Store only the real action columns (block last dim == full output dim).
    out_ref[...] = probs[:, :num_actions].astype(out_ref.dtype)


def prepare_policy_params(w1, b1, w2, b2):
    """One-time parameter prep (hoisted out of the per-call forward):
    bf16 weights for the MXU, f32 biases, fc2 lane-padded to 128 with a
    -1e30 bias on the padded action lanes."""
    A = int(w2.shape[1])
    A_pad = _round_up(max(A, _LANE), _LANE)
    w1b = jnp.asarray(w1, jnp.bfloat16)
    b1f = jnp.asarray(b1, jnp.float32).reshape(1, -1)
    w2p = jnp.pad(jnp.asarray(w2, jnp.bfloat16), ((0, 0), (0, A_pad - A)))
    b2p = jnp.pad(jnp.asarray(b2, jnp.float32).reshape(1, -1),
                  ((0, 0), (0, A_pad - A)), constant_values=_NEG_BIG)
    return (w1b, b1f, w2p, b2p), A


def _choose_batch_tiling(B, block_b):
    """Pick (tile_rows, padded_batch).  Prefers: big tiles (amortize the
    ~0.35us/step pipeline overhead), >=2 grid steps for large batches (v7x
    megacore), and an exact divisor of the batch (no jnp.pad round trip)."""
    B8 = _round_up(B, 8)
    tb = min(_round_up(block_b, 8), B8)
    # Large batch that would otherwise be a single step: split in two so the
    # "parallel" grid axis can use both TensorCores on v7x.
    if tb >= B8 and B8 >= 2 * _MIN_SPLIT_ROWS:
        tb = _round_up(-(-B8 // 2), 8)
    if B8 % tb != 0:
        # Largest multiple-of-8 divisor of B8 that is <= tb: zero batch padding.
        d = tb - (tb % 8)
        while d >= 8 and B8 % d != 0:
            d -= 8
        if d >= max(_MIN_SPLIT_ROWS // 2, tb // 4):
            tb = d
        else:
            # No good divisor: balance the tiles so padding stays tiny.
            n = -(-B8 // tb)
            tb = _round_up(-(-B8 // n), 8)
    B_pad = _round_up(B8, tb)
    if B_pad // tb == 1 and B_pad != B:
        # Single-tile case: a block equal to the full (unpadded) batch is legal
        # even when B % 8 != 0 and avoids the jnp.pad pass over x.
        tb = B_pad = B
    return tb, B_pad


@functools.partial(jax.jit, static_argnames=("num_actions", "block_b"))
def policy_forward(x, params, num_actions, *, block_b=2048):
    """x: [B, state_size]; params from prepare_policy_params(). Sweep block_b."""
    w1b, b1f, w2p, b2p = params
    B, K = x.shape
    H = w1b.shape[1]
    A_pad = w2p.shape[1]
    A = num_actions

    tb, B_pad = _choose_batch_tiling(B, block_b)
    xp = x if B_pad == B else jnp.pad(x, ((0, B_pad - B), (0, 0)))
    grid = (B_pad // tb,)

    cost = pl.CostEstimate(
        flops=2 * B_pad * (K * H + H * A_pad),
        transcendentals=B_pad * A_pad,
        bytes_accessed=(B_pad * K * 4                       # x (f32 read)
                        + w1b.size * 2 + b1f.size * 4
                        + w2p.size * 2 + b2p.size * 4
                        + B_pad * A * 4),                   # compact f32 output
    )

    out = pl.pallas_call(
        functools.partial(policy_kernel, num_actions=A),
        out_shape=jax.ShapeDtypeStruct((B_pad, A), jnp.float32),
        grid=grid,
        in_specs=[
            pl.BlockSpec((tb, K), lambda i: (i, 0)),        # x: one row tile / step
            pl.BlockSpec((K, H), lambda i: (0, 0)),         # w1: VMEM-resident
            pl.BlockSpec((1, H), lambda i: (0, 0)),         # b1: VMEM-resident
            pl.BlockSpec((H, A_pad), lambda i: (0, 0)),     # w2 (lane-padded): resident
            pl.BlockSpec((1, A_pad), lambda i: (0, 0)),     # b2 (lane-padded): resident
        ],
        # Compact output block: last dim == full array dim (A), so a sub-128
        # block is legal; masked stores in exchange for 16x fewer write bytes.
        out_specs=pl.BlockSpec((tb, A), lambda i: (i, 0)),
        compiler_params=pltpu.CompilerParams(
            dimension_semantics=("parallel",)),             # batch -> both TCs on v7x
        cost_estimate=cost,
    )(xp, w1b, b1f, w2p, b2p)

    return out if B_pad == B else out[:B]


def init_policy_params(key, state_size, num_actions, h1=256):
    # Deterministic synthetic init (uniform, torch-Linear-like scale).
    k1, k2, k3, k4 = jax.random.split(key, 4)
    lim1 = 1.0 / jnp.sqrt(state_size)
    lim2 = 1.0 / jnp.sqrt(h1)
    w1 = jax.random.uniform(k1, (state_size, h1), jnp.float32, -lim1, lim1)
    b1 = jax.random.uniform(k2, (1, h1), jnp.float32, -lim1, lim1)
    w2 = jax.random.uniform(k3, (h1, num_actions), jnp.float32, -lim2, lim2)
    b2 = jax.random.uniform(k4, (1, num_actions), jnp.float32, -lim2, lim2)
    return w1, b1, w2, b2


if __name__ == "__main__":
    key = jax.random.PRNGKey(0)
    kx, kp = jax.random.split(key)

    batch, state_size, num_actions, h1 = 8, 32, 8, 256

    x = jax.random.normal(kx, (batch, state_size), jnp.float32)
    w1, b1, w2, b2 = init_policy_params(kp, state_size, num_actions, h1)

    # One-time parameter prep (hoisted out of the forward).
    params, A = prepare_policy_params(w1, b1, w2, b2)

    out = policy_forward(x, params, A)
    out = jax.block_until_ready(out)

    # Pure-JAX reference with matching bf16-matmul / f32-accumulate semantics.
    xb, w1r, w2r = (a.astype(jnp.bfloat16) for a in (x, w1, w2))
    ref_h = jnp.maximum(
        jnp.dot(xb, w1r, preferred_element_type=jnp.float32) + b1, 0.0)
    ref_logits = jnp.dot(ref_h.astype(jnp.bfloat16), w2r,
                         preferred_element_type=jnp.float32) + b2
    ref = jax.nn.softmax(ref_logits, axis=1)

    assert out.shape == (batch, num_actions)
    assert bool(jnp.all(jnp.isfinite(out)))
    assert jnp.allclose(out, ref, atol=1e-3, rtol=1e-3), \
        float(jnp.max(jnp.abs(out - ref)))
    # Exact divide in the kernel -> rows sum to 1 at f32 precision.
    assert jnp.allclose(jnp.sum(out, axis=1), 1.0, atol=1e-4)

    print("KERNEL_OK")
</pallas_src>

<mosaic_0001>
module attributes {stable_mosaic.version = 11 : i64} {
  func.func @policy_kernel(%arg0: i32, %arg1: memref<8x32xf32, #tpu.memory_space<vmem>>, %arg2: memref<32x256xbf16, #tpu.memory_space<vmem>>, %arg3: memref<1x256xf32, #tpu.memory_space<vmem>>, %arg4: memref<256x128xbf16, #tpu.memory_space<vmem>>, %arg5: memref<1x128xf32, #tpu.memory_space<vmem>>, %arg6: memref<8x8xf32, #tpu.memory_space<vmem>>) attributes {dimension_semantics = [#tpu.dimension_semantics<parallel>], iteration_bounds = array<i64: 1>, scalar_prefetch = 0 : i64, scratch_operands = 0 : i64, tpu.core_type = #tpu.core_type<tc>, window_params = [{transform_indices = @transform_0, window_bounds = array<i64: 8, 32>}, {pipeline_mode = #tpu.pipeline_mode<synchronous>, transform_indices = @transform_1, window_bounds = array<i64: 32, 256>}, {pipeline_mode = #tpu.pipeline_mode<synchronous>, transform_indices = @transform_2, window_bounds = array<i64: 1, 256>}, {pipeline_mode = #tpu.pipeline_mode<synchronous>, transform_indices = @transform_3, window_bounds = array<i64: 256, 128>}, {pipeline_mode = #tpu.pipeline_mode<synchronous>, transform_indices = @transform_4, window_bounds = array<i64: 1, 128>}, {transform_indices = @transform_5, window_bounds = array<i64: 8, 8>}]} {
    %c0 = arith.constant 0 : index
    %c0_0 = arith.constant 0 : index
    %0 = vector.load %arg1[%c0, %c0_0] : memref<8x32xf32, #tpu.memory_space<vmem>>, vector<8x32xf32>
    %1 = arith.truncf %0 : vector<8x32xf32> to vector<8x32xbf16>
    %c0_1 = arith.constant 0 : index
    %c0_2 = arith.constant 0 : index
    %2 = vector.load %arg2[%c0_1, %c0_2] : memref<32x256xbf16, #tpu.memory_space<vmem>>, vector<32x256xbf16>
    %cst = arith.constant dense<0.000000e+00> : vector<8x256xf32>
    %3 = tpu.matmul %1, %2, %cst {dimension_numbers = #tpu.dot_dimension_numbers<[1], [0], [0], [1], [0, 0, 1, 1], [], []>} : vector<8x32xbf16>, vector<32x256xbf16>, vector<8x256xf32> -> vector<8x256xf32>
    %c0_3 = arith.constant 0 : index
    %c0_4 = arith.constant 0 : index
    %4 = vector.load %arg3[%c0_3, %c0_4] : memref<1x256xf32, #tpu.memory_space<vmem>>, vector<1x256xf32>
    %5 = vector.broadcast %4 : vector<1x256xf32> to vector<8x256xf32>
    %6 = arith.addf %3, %5 : vector<8x256xf32>
    %cst_5 = arith.constant 0.000000e+00 : f32
    %7 = vector.broadcast %cst_5 : f32 to vector<8x256xf32>
    %8 = arith.maximumf %6, %7 : vector<8x256xf32>
    %9 = arith.truncf %8 : vector<8x256xf32> to vector<8x256xbf16>
    %c0_6 = arith.constant 0 : index
    %c0_7 = arith.constant 0 : index
    %10 = vector.load %arg4[%c0_6, %c0_7] : memref<256x128xbf16, #tpu.memory_space<vmem>>, vector<256x128xbf16>
    %cst_8 = arith.constant dense<0.000000e+00> : vector<8x128xf32>
    %11 = tpu.matmul %9, %10, %cst_8 {dimension_numbers = #tpu.dot_dimension_numbers<[1], [0], [0], [1], [0, 0, 1, 1], [], []>} : vector<8x256xbf16>, vector<256x128xbf16>, vector<8x128xf32> -> vector<8x128xf32>
    %c0_9 = arith.constant 0 : index
    %c0_10 = arith.constant 0 : index
    %12 = vector.load %arg5[%c0_9, %c0_10] : memref<1x128xf32, #tpu.memory_space<vmem>>, vector<1x128xf32>
    %13 = vector.broadcast %12 : vector<1x128xf32> to vector<8x128xf32>
    %14 = arith.addf %11, %13 : vector<8x128xf32>
    %cst_11 = arith.constant dense<0xFF800000> : vector<8xf32>
    %15 = vector.multi_reduction <maximumf>, %14, %cst_11 [1] : vector<8x128xf32> to vector<8xf32>
    %16 = vector.shape_cast %15 : vector<8xf32> to vector<8x1xf32>
    %17 = vector.broadcast %16 : vector<8x1xf32> to vector<8x128xf32>
    %18 = arith.subf %14, %17 : vector<8x128xf32>
    %19 = math.exp %18 : vector<8x128xf32>
    %cst_12 = arith.constant dense<0.000000e+00> : vector<8xf32>
    %20 = vector.multi_reduction <add>, %19, %cst_12 [1] : vector<8x128xf32> to vector<8xf32>
    %21 = vector.shape_cast %20 : vector<8xf32> to vector<8x1xf32>
    %22 = vector.broadcast %21 : vector<8x1xf32> to vector<8x128xf32>
    %23 = arith.divf %19, %22 : vector<8x128xf32>
    %24 = vector.extract_strided_slice %23 {offsets = [0, 0], sizes = [8, 8], strides = [1, 1]} : vector<8x128xf32> to vector<8x8xf32>
    %c0_13 = arith.constant 0 : index
    %c0_14 = arith.constant 0 : index
    %25 = vector.load %arg6[%c0_13, %c0_14] : memref<8x8xf32, #tpu.memory_space<vmem>>, vector<8x8xf32>
    tpu.vector_store %arg6[%c0_13, %c0_14], %24 {strides = array<i32>} : memref<8x8xf32, #tpu.memory_space<vmem>>, vector<8x8xf32>,
    return
  }
  func.func @transform_0(%arg0: i32) -> (i32, i32) {
    %c0_i32 = arith.constant 0 : i32
    %c0_i32_0 = arith.constant 0 : i32
    return %arg0, %c0_i32 : i32, i32
  }
  func.func @transform_1(%arg0: i32) -> (i32, i32) {
    %c0_i32 = arith.constant 0 : i32
    %c0_i32_0 = arith.constant 0 : i32
    %c0_i32_1 = arith.constant 0 : i32
    return %c0_i32, %c0_i32_0 : i32, i32
  }
  func.func @transform_2(%arg0: i32) -> (i32, i32) {
    %c0_i32 = arith.constant 0 : i32
    %c0_i32_0 = arith.constant 0 : i32
    %c0_i32_1 = arith.constant 0 : i32
    return %c0_i32, %c0_i32_0 : i32, i32
  }
  func.func @transform_3(%arg0: i32) -> (i32, i32) {
    %c0_i32 = arith.constant 0 : i32
    %c0_i32_0 = arith.constant 0 : i32
    %c0_i32_1 = arith.constant 0 : i32
    return %c0_i32, %c0_i32_0 : i32, i32
  }
  func.func @transform_4(%arg0: i32) -> (i32, i32) {
    %c0_i32 = arith.constant 0 : i32
    %c0_i32_0 = arith.constant 0 : i32
    %c0_i32_1 = arith.constant 0 : i32
    return %c0_i32, %c0_i32_0 : i32, i32
  }
  func.func @transform_5(%arg0: i32) -> (i32, i32) {
    %c0_i32 = arith.constant 0 : i32
    %c0_i32_0 = arith.constant 0 : i32
    return %arg0, %c0_i32 : i32, i32
  }
}

</mosaic_0001>

<bundles_post_ra>
// kernel: policy_forward.1
= control target key start
LH: loop header
LB: loop body
LE: loop exit
PB: predicated region body
PF: predicated region fallthrough
CT: control target
= control target key end

     0   :  { %10 = vsyncpa [#allocation3], 0  ;;  %s572_s0 = inlined_call_operand.hbm [shape: f32[8,32], index: 0, kind: input, shape index: {}]   ;;  %s573_s1 = inlined_call_operand.hbm [shape: bf16[32,256], index: 1, kind: input, shape index: {}]   ;;  %s574_s2 = inlined_call_operand.vmem [shape: f32[1,256], index: 2, kind: input, shape index: {}]   ;;  %s575_s3 = inlined_call_operand.hbm [shape: bf16[256,128], index: 3, kind: input, shape index: {}]   ;;  %s576_s4 = inlined_call_operand.vmem [shape: f32[1,128], index: 4, kind: input, shape index: {}]   ;;  %s577_s5 = inlined_call_operand.hbm [shape: f32[8,8], index: 5, kind: output, shape index: {}]  }
   0x1   :  { %11 = vsyncpa [#allocation6], 0 }
   0x2   :  { %12 = vsyncpa [#allocation4], 0  ;;  %s515_s18 = smov [#allocation5]  }
   0x3   :  { %s28_s19 = sshll.u32 %s515_s18, 4  ;;  %s29_s19 = int_to_ptr.vmem [resolvable:$true] %s28_s19 }
   0x4   :  { %s437_s20 = scalar_lea.vmem %s29_s19, 512  ;;  %p442_p1 = scmp.lt.s32.totalorder %s29_s19, %s29_s19 }
   0x5   :  { %p438_p0 = scmp.ne.s32.totalorder %s29_s19, %s437_s20  ;;  %p443_p2 = scmp.lt.s32.totalorder %s437_s20, %s437_s20 }
   0x7   :  { %p444_p3 = por %p443_p2, %p442_p1 }
   0x9   :  { %p445_p4 = pnand %p444_p3, %p438_p0 }
   0xb   :  { %448 = shalt.err (!%p445_p4)
}
   0xc   :  { %s516_s21 = smov 128   ;;  %s517_s22 = smov 8  }
   0xd   :  { %34 = dma.hbm_to_vmem [thread:$0]  %s573_s1, 512, %s29_s19, [#allocation6], %s516_s21, %s516_s21, %s517_s22  }
   0xe   :  { %s518_s25 = smov [#allocation2]   ;;  %s519_s27 = smov [#allocation7]  }
   0xf   :  { %s19_s26 = sshll.u32 %s518_s25, 4  ;;  %s42_s28 = sshll.u32 %s519_s27, 4  ;;  %s20_s26 = int_to_ptr.vmem [resolvable:$true] %s19_s26  ;;  %s43_s28 = int_to_ptr.vmem [resolvable:$true] %s42_s28 }
  0x10   :  { %s457_s29 = scalar_lea.vmem %s20_s26, 128  ;;  %p462_p6 = scmp.lt.s32.totalorder %s20_s26, %s20_s26 }
  0x11   :  { %p458_p5 = scmp.ne.s32.totalorder %s20_s26, %s457_s29  ;;  %p463_p7 = scmp.lt.s32.totalorder %s457_s29, %s457_s29 }
  0x13   :  { %p464_p8 = por %p463_p7, %p462_p6 }
  0x15   :  { %p465_p9 = pnand %p464_p8, %p458_p5 }
  0x17   :  { %468 = shalt.err (!%p465_p9)
}
  0x18   :  { %22 = dma.hbm_to_vmem [thread:$0]  %s572_s0, 128, %s20_s26, [#allocation3]  }
  0x19   :  { %s477_s7 = scalar_lea.vmem %s43_s28, 2048  ;;  %p482_p11 = scmp.lt.s32.totalorder %s43_s28, %s43_s28 }
  0x1a   :  { %p478_p10 = scmp.ne.s32.totalorder %s43_s28, %s477_s7  ;;  %p483_p12 = scmp.lt.s32.totalorder %s477_s7, %s477_s7 }
  0x1c   :  { %p484_p13 = por %p483_p12, %p482_p11 }
  0x1e   :  { %p485_p0 = pnand %p484_p13, %p478_p10 }
  0x20   :  { %488 = shalt.err (!%p485_p0)
}
  0x21   :  { %s520_s1 = smov 64   ;;  %s521_s8 = smov 4  }
  0x22   :  { %48 = dma.hbm_to_vmem [thread:$0]  %s575_s3, 2048, %s43_s28, [#allocation6], %s520_s1, %s520_s1, %s521_s8  }
  0x23   :  { %509 = dma.done.wait [#allocation3], 128  }
  0x24   :  { %510 = vsyncadd [#allocation3], 4294967168 }
  0x25   :  { %511 = dma.done.wait [#allocation6], 2560  }
  0x26   :  { %512 = vsyncadd [#allocation6], 4294964736  ;;  %v522_v0 = vmov 0   ;;  %v403_v1 = vld [vmem:[#allocation5 + $0x14] ss:$8 sps:$4 sm:$0xff]   ;;  %vm99_vm0 = vcmask 261120   ;;  %v69_v23 = vlaneseq }
  0x27   :  { %135 = vmatprep.mubr.bf16.mxu0 %v522_v0  ;;  %v405_v2 = vld [vmem:[#allocation5 + $0x10] ss:$8 sps:$4 sm:$0xff]   ;;  %115 = vmatprep.subr.bf16.mxu0 %v403_v1  ;;  %v406_v3 = vld [vmem:[#allocation5 + $0x4] ss:$8 sps:$4 sm:$0xff]   ;;  %v408_v4 = vld [vmem:[#allocation5] ss:$8 sps:$4 sm:$0xff]  }
  0x28   :  { %v61_v5 = vld [vmem:[#allocation2] sm:$0xff]  ;;  %116 = vmatpush1.bf16.msra.mxu0 %v405_v2  ;;  %v411_v8 = vld [vmem:[#allocation7 + $0x70] sm:$0xff]   ;;  %v413_v11 = vld [vmem:[#allocation7 + $0x68] sm:$0xff]   ;;  %v70_v24 = vshrl.u32 %v69_v23, 7  ;;  %vm332_vm1 = vcmask 64512  }
  0x29   :  { %v409_v6 = vld [vmem:[#allocation7 + $0x78] sm:$0xff]   ;;  %117 = vmatprep.subr.bf16.mxu0 %v406_v3  ;;  %v62_v9 = vpack.c.bf16 %v61_v5, %v61_v5  ;;  %v412_v10 = vld [vmem:[#allocation7 + $0x30] sm:$0xff]   ;;  %v414_v12 = vld [vmem:[#allocation7 + $0x28] sm:$0xff]  }
  0x2a   :  { %v410_v7 = vld [vmem:[#allocation7 + $0x38] sm:$0xff]   ;;  %372 = vmatprep.subr.bf16.mxu1 %v409_v6  ;;  %v415_v13 = vld [vmem:[#allocation7 + $0x60] sm:$0xff]   ;;  %v419_v17 = vld [vmem:[#allocation7 + $0x50] sm:$0xff]   ;;  %v71_v25 = vsub.s32 0, %v70_v24  ;;  %v75_v27 = vsub.s32 1, %v70_v24 }
  0x2b   :  { %373 = vmatpush3.bf16.msra.mxu1 %v410_v7  ;;  %v416_v14 = vld [vmem:[#allocation7 + $0x20] sm:$0xff]   ;;  %v417_v15 = vld [vmem:[#allocation7 + $0x58] sm:$0xff]   ;;  %v420_v18 = vld [vmem:[#allocation7 + $0x10] sm:$0xff]  }
  0x2c   :  { %118 = vmatpush1.bf16.msra.mxu0 %v408_v4  ;;  %374 = vmatprep.subr.bf16.mxu1 %v411_v8  ;;  %v418_v16 = vld [vmem:[#allocation7 + $0x18] sm:$0xff]   ;;  %v421_v19 = vld [vmem:[#allocation7 + $0x48] sm:$0xff]   ;;  %v423_v21 = vld [vmem:[#allocation7 + $0x40] sm:$0xff]  }
  0x2d   :  { %v422_v20 = vld [vmem:[#allocation7 + $0x8] sm:$0xff]   ;;  %v424_v22 = vld [vmem:[#allocation7] sm:$0xff]   ;;  %v67_v26 = vld [vmem:[%s574_s2] sm:$0x3]  ;;  %s523_s2 = smov [#allocation8]  }
  0x2e   :  { %v72_v28 = vrot.slane %v67_v26, %v71_v25  ;;  %v76_v29 = vrot.slane %v67_v26, %v75_v27  ;;  %v355_v42 = vld [vmem:[%s576_s4] ss:$0 sm:$0xff]  ;;  %s340_s13 = sshll.u32 %s523_s2, 4  ;;  %s341_s13 = int_to_ptr.vmem [resolvable:$true] %s340_s13 }
  0x2f   :  { %354 = vmatmul.mubr.msk.bf16.vlgmr.msra.gmra.mxu0 %vm99_vm0, %v62_v9  ;;  %375 = vmatpush3.bf16.msra.mxu1 %v412_v10  ;;  %s489_s4 = scalar_lea.vmem %s341_s13, 128  ;;  %p494_p2 = scmp.lt.s32.totalorder %s341_s13, %s341_s13 }
  0x30   :  { %376 = vmatprep.subr.bf16.mxu1 %v413_v11  ;;  %p490_p1 = scmp.ne.s32.totalorder %s341_s13, %s489_s4  ;;  %p495_p3 = scmp.lt.s32.totalorder %s489_s4, %s489_s4 }
  0x32   :  { %p496_p4 = por %p495_p3, %p494_p2 }
  0x33   :  { %377 = vmatpush3.bf16.msra.mxu1 %v414_v12 }
  0x34   :  { %378 = vmatprep.subr.bf16.mxu1 %v415_v13  ;;  %p497_p5 = pnand %p496_p4, %p490_p1 }
  0x37   :  { %379 = vmatpush3.bf16.msra.mxu1 %v416_v14 }
  0x38   :  { %380 = vmatprep.subr.bf16.mxu1 %v417_v15 }
  0x3b   :  { %381 = vmatpush3.bf16.msra.mxu1 %v418_v16 }
  0x3c   :  { %382 = vmatprep.subr.bf16.mxu1 %v419_v17 }
  0x3f   :  { %383 = vmatpush3.bf16.msra.mxu1 %v420_v18 }
  0x40   :  { %384 = vmatprep.subr.bf16.mxu1 %v421_v19 }
  0x43   :  { %385 = vmatpush3.bf16.msra.mxu1 %v422_v20 }
  0x44   :  { %386 = vmatprep.subr.bf16.mxu1 %v423_v21 }
  0x47   :  { %387 = vmatpush3.bf16.msra.mxu1 %v424_v22 }
  0xef   :  { %v137_v30 = vpop.f32.mrf.mxu0 }
  0xf0   :  { %v138_v31 = vadd.f32 %v137_v30, %v72_v28 }
  0xf1   :  { %v139_v32 = vpop.f32.mrf.mxu0 }
  0xf2   :  { %v140_v33 = vadd.f32 %v139_v32, %v76_v29  ;;  %v144_v34 = vmax.f32 %v138_v31, 0.0 }
  0xf3   :  { %v141_v35 = vpop.f32.mrf.mxu0 }
  0xf4   :  { %v145_v36 = vmax.f32 %v140_v33, 0.0  ;;  %v146_v39 = vpack.c.bf16 %v144_v34, %v144_v34 }
  0xf5   :  { %v142_v37 = vpop.f32.mrf.mxu0 }
  0xf6   :  { %v147_v38 = vpack.c.bf16 %v145_v36, %v145_v36 }
  0xf8   :  { %315 = vmatprep.mubr.bf16.mxu1 %v147_v38 }
  0xf9   :  { %316 = vmatmul.mubr.bf16.vlgmr.msra.gmra.mxu1 %v146_v39 }
 0x1b9   :  { %v388_v40 = vpop.f32.mrf.mxu1 }
 0x1bb   :  { %v389_v41 = vpop.f32.mrf.mxu1 }
 0x1bc   :  { %v390_v43 = vadd.f32 %v389_v41, %v388_v40 }
 0x1bd   :  { %v391_v44 = vpop.f32.mrf.mxu1 }
 0x1be   :  { %v318_v45 = vadd.f32 %v390_v43, %v355_v42 }
 0x1bf   :  { %v392_v46 = vpop.f32.mrf.mxu1 }
 0x1c0   :  { %323 = vmax.xlane.f32.xlu0 %v318_v45 }
 0x249   :  { %v324_v47 = vpop.xlane.xlu0 %323 }
 0x24a   :  { %v325_v48 = vsub.f32 %v318_v45, %v324_v47 }
 0x24c   :  { %v326_v49 = vmul.f32 1.442695, %v325_v48 }
 0x24e   :  { %425 = vpow2.f32 %v326_v49 }
 0x25b   :  { %v426_v50 = vpop.eup %425 }
 0x25c   :  { %328 = vadd.xlane.f32.xlu0 %v426_v50 }
 0x2e5   :  { %v329_v51 = vpop.xlane.xlu0 %328 }
 0x2e6   :  { %427 = vrcp.f32 %v329_v51 }
 0x2f3   :  { %v428_v52 = vpop.eup %427 }
 0x2f4   :  { %v331_v53 = vmul.f32 %v428_v52, %v426_v50 }
 0x2f6   :  { %333 = vst.msk [vmem:[#allocation8] sm:$0xff] %vm332_vm1, %v331_v53 }
 0x2f7   :  { %500 = shalt.err (!%p497_p5)
}
 0x2f8   :  { %343 = dma.vmem_to_hbm [thread:$0]  %s341_s13, 128, %s577_s5, [#allocation4]  }
 0x2f9   :  { %513 = dma.done.wait [#allocation4], 128  }
 0x2fa   :  { %514 = vsyncadd [#allocation4], 4294967168 }
 0x2fb   :  { %347 = vsyncpa [#allocation3], 1 }
 0x2fc   :  { %348 = vsyncpa [#allocation6], 1 }
 0x2fd   :  { %349 = vsyncpa [#allocation4], 1 }

</bundles_post_ra>
